<compile_context>
chip_gen: v7x
topology: tpu7x:2x2x1
jax: 0.10.0
libtpu: 0.0.40
codegen_flags: <defaults>
</compile_context>

<pallas_src>
import functools

import jax
import jax.numpy as jnp
from jax.experimental import pallas as pl
from jax.experimental.pallas import tpu as pltpu


_VMEM_LIMIT = 48 * 1024 * 1024  # safe on v5e/v6e (128 MiB phys) and v7x (64 MiB phys)


# ----------------------------- helpers ---------------------------------------
def _round_up(x, m):
    return ((x + m - 1) // m) * m


def _pad2(x, rows, cols, value=0.0):
    return jnp.pad(x, ((0, rows - x.shape[0]), (0, cols - x.shape[1])),
                   constant_values=value)


def _pad1(v, cols, value=0.0):
    return jnp.pad(v, (0, cols - v.shape[0]), constant_values=value)


def _pick_tile(dim, candidates=(512, 256, 128)):
    for c in candidates:
        if dim % c == 0:
            return c
    return dim


# ----------------------------- Pallas kernels --------------------------------
def linear_kernel(x_ref, w_ref, o_ref):
    """One (row, fout) tile of XW = X @ W (bf16 in, f32 acc, bf16 out)."""
    o_ref[...] = jnp.dot(x_ref[...], w_ref[...],
                         preferred_element_type=jnp.float32).astype(o_ref.dtype)


def agg_fused_kernel(a_ref, xw0_ref, b0_ref, scale_ref, shift_ref, w1_ref,
                     o_ref, acc_ref):
    """Layer-0 aggregation fused with bias + BN + ReLU and layer-1's X @ W1.

    acc += A_tile @ XW0_tile over k; on last k:
      h = relu((acc + b0) * scale + shift)   [tm, h_pad]
      o = h @ W1                             [tm, o_pad]
    """
    @pl.when(pl.program_id(1) == 0)
    def _():
        acc_ref[...] = jnp.zeros_like(acc_ref)

    acc_ref[...] += jnp.dot(a_ref[...], xw0_ref[...],
                            preferred_element_type=jnp.float32)

    @pl.when(pl.program_id(1) == pl.num_programs(1) - 1)
    def _():
        h = acc_ref[...] + b0_ref[...]
        h = jnp.maximum(h * scale_ref[...] + shift_ref[...], 0.0)
        o_ref[...] = jnp.dot(h.astype(w1_ref.dtype), w1_ref[...],
                             preferred_element_type=jnp.float32
                             ).astype(o_ref.dtype)


def aggregate_bn_relu_kernel(a_ref, xw_ref, b_ref, scale_ref, shift_ref,
                             o_ref, acc_ref):
    """acc += A_tile @ XW_tile; on last k: +bias, folded BN, ReLU, store."""
    @pl.when(pl.program_id(2) == 0)
    def _():
        acc_ref[...] = jnp.zeros_like(acc_ref)

    acc_ref[...] += jnp.dot(a_ref[...], xw_ref[...],
                            preferred_element_type=jnp.float32)

    @pl.when(pl.program_id(2) == pl.num_programs(2) - 1)
    def _():
        h = acc_ref[...] + b_ref[...]
        o_ref[...] = jnp.maximum(h * scale_ref[...] + shift_ref[...],
                                 0.0).astype(o_ref.dtype)


def aggregate_bias_kernel(a_ref, xw_ref, b_ref, o_ref, acc_ref):
    """acc += A_tile @ XW_tile; on last k: +bias, store."""
    @pl.when(pl.program_id(2) == 0)
    def _():
        acc_ref[...] = jnp.zeros_like(acc_ref)

    acc_ref[...] += jnp.dot(a_ref[...], xw_ref[...],
                            preferred_element_type=jnp.float32)

    @pl.when(pl.program_id(2) == pl.num_programs(2) - 1)
    def _():
        o_ref[...] = (acc_ref[...] + b_ref[...]).astype(o_ref.dtype)


# ----------------------------- wrappers ---------------------------------------
def linear(x, w):
    """X @ W with the weight tiled over fout so VMEM is bounded by the tile.

    x: [N_pad, Fin_pad] bf16, w: [Fin_pad, Fout_pad] bf16 -> [N_pad, Fout_pad] bf16.
    """
    n, fin = x.shape
    fout = w.shape[1]
    tm = 256 if n >= 512 else 128
    tn = fout if fout <= 512 else _pick_tile(fout)
    return pl.pallas_call(
        linear_kernel,
        out_shape=jax.ShapeDtypeStruct((n, fout), jnp.bfloat16),
        grid_spec=pltpu.PrefetchScalarGridSpec(
            num_scalar_prefetch=0,
            grid=(n // tm, fout // tn),
            in_specs=[pl.BlockSpec((tm, fin), lambda i, j: (i, 0)),
                      pl.BlockSpec((fin, tn), lambda i, j: (0, j))],
            out_specs=pl.BlockSpec((tm, tn), lambda i, j: (i, j))),
        compiler_params=pltpu.CompilerParams(
            dimension_semantics=("parallel", "parallel"),
            vmem_limit_bytes=_VMEM_LIMIT),
    )(x, w)


def gcn_aggregate_fused(a, xw0, b0, scale, shift, w1, *, out_dtype=jnp.bfloat16):
    """Fused layer-0 aggregation: xw1 = (relu(BN(A@XW0 + b0))) @ W1.

    a: [N_pad, N_pad] bf16, xw0: [N_pad, h_pad] bf16, w1: [h_pad, o_pad] bf16,
    b0/scale/shift: [1, h_pad] f32. Full-width feature tile -> A streams once.
    """
    n = a.shape[0]
    h = xw0.shape[1]
    o = w1.shape[1]
    tm = 256 if n >= 512 else 128
    tk = 512 if n % 512 == 0 else 256
    grid = (n // tm, n // tk)

    const_vec = pl.BlockSpec((1, h), lambda i, k: (0, 0))
    return pl.pallas_call(
        agg_fused_kernel,
        out_shape=jax.ShapeDtypeStruct((n, o), out_dtype),
        grid_spec=pltpu.PrefetchScalarGridSpec(
            num_scalar_prefetch=0,
            grid=grid,
            in_specs=[pl.BlockSpec((tm, tk), lambda i, k: (i, k)),   # A
                      pl.BlockSpec((tk, h), lambda i, k: (k, 0)),    # XW0
                      const_vec,                                     # b0
                      const_vec,                                     # scale
                      const_vec,                                     # shift
                      pl.BlockSpec((h, o), lambda i, k: (0, 0))],    # W1 (resident)
            out_specs=pl.BlockSpec((tm, o), lambda i, k: (i, 0)),
            scratch_shapes=[pltpu.VMEM((tm, h), jnp.float32)]),
        compiler_params=pltpu.CompilerParams(
            dimension_semantics=("parallel", "arbitrary"),
            vmem_limit_bytes=_VMEM_LIMIT),
    )(a, xw0, b0, scale, shift, w1)


def gcn_aggregate(a, xw, b, scale=None, shift=None, *, out_dtype):
    """Tiled A @ XW + b (optionally folded-BN + ReLU).

    a: [N_pad, N_pad] bf16, xw: [N_pad, F_pad] bf16, b/scale/shift: [1, F_pad] f32.
    Feature tile tn = F_pad when F_pad <= 1024 so A streams from HBM once.
    """
    n = a.shape[0]
    f = xw.shape[1]
    tm = 256 if n >= 512 else 128
    tk = 512 if n % 512 == 0 else 256
    tn = f if f <= 1024 else _pick_tile(f)
    grid = (n // tm, f // tn, n // tk)

    vec_spec = pl.BlockSpec((1, tn), lambda i, j, k: (0, j))
    in_specs = [pl.BlockSpec((tm, tk), lambda i, j, k: (i, k)),
                pl.BlockSpec((tk, tn), lambda i, j, k: (k, j)),
                vec_spec]
    operands = [a, xw, b]
    if scale is not None:
        in_specs += [vec_spec, vec_spec]
        operands += [scale, shift]
        kernel = aggregate_bn_relu_kernel
    else:
        kernel = aggregate_bias_kernel

    return pl.pallas_call(
        kernel,
        out_shape=jax.ShapeDtypeStruct((n, f), out_dtype),
        grid_spec=pltpu.PrefetchScalarGridSpec(
            num_scalar_prefetch=0,
            grid=grid,
            in_specs=in_specs,
            out_specs=pl.BlockSpec((tm, tn), lambda i, j, k: (i, j)),
            scratch_shapes=[pltpu.VMEM((tm, tn), jnp.float32)]),
        compiler_params=pltpu.CompilerParams(
            dimension_semantics=("parallel", "parallel", "arbitrary"),
            vmem_limit_bytes=_VMEM_LIMIT),
    )(*operands)


# ----------------------------- JAX glue --------------------------------------
def normalized_adjacency(edge_index, num_nodes):
    """Dense D^-1/2 (A + I) D^-1/2 as used by GCNConv (add_self_loops=True).

    Note: duplicate edges are deduplicated and pre-existing self loops are not
    handled specially (fine for clean edge lists like the test graph)."""
    src, dst = edge_index[0], edge_index[1]
    adj = jnp.zeros((num_nodes, num_nodes), dtype=jnp.float32)
    adj = adj.at[dst, src].set(1.0)                       # message src -> dst
    adj = adj + jnp.eye(num_nodes, dtype=jnp.float32)     # self loops
    deg = adj.sum(axis=1)
    dinv = jnp.where(deg > 0, jax.lax.rsqrt(deg), 0.0)
    return dinv[:, None] * adj * dinv[None, :]


def prepare_static_operands(a_norm, params):
    """Pad + cast all per-graph / per-parameter operands ONCE (hoisted out of
    the per-forward jit): adjacency to bf16, weights to bf16, BN folded to
    per-feature scale/shift in f32."""
    (w0, b0), (gamma, beta, rmean, rvar, eps), (w1, b1) = params
    n = a_norm.shape[0]
    fin, hidden = w0.shape
    fout = w1.shape[1]

    n_pad = _round_up(n, 256)        # guarantees the wide-tk MXU path
    fin_pad = _round_up(fin, 128)
    h_pad = _round_up(hidden, 128)
    o_pad = _round_up(fout, 128)

    # Fold eval-mode BatchNorm into per-feature scale/shift.
    scale = gamma / jnp.sqrt(rvar + eps)
    shift = beta - rmean * scale

    return {
        "a": _pad2(a_norm, n_pad, n_pad).astype(jnp.bfloat16),
        "w0": _pad2(w0, fin_pad, h_pad).astype(jnp.bfloat16),
        "w1": _pad2(w1, h_pad, o_pad).astype(jnp.bfloat16),
        "b0": _pad1(b0, h_pad).astype(jnp.float32).reshape(1, h_pad),
        "b1": _pad1(b1, o_pad).astype(jnp.float32).reshape(1, o_pad),
        "scale": _pad1(scale, h_pad, value=1.0).astype(jnp.float32).reshape(1, h_pad),
        "shift": _pad1(shift, h_pad).astype(jnp.float32).reshape(1, h_pad),
    }


@functools.partial(jax.jit, static_argnames=("num_nodes", "out_channels"))
def gcn_encoder_forward(x, ops, *, num_nodes, out_channels):
    """Eval-mode forward of GCNEncoder (num_layers=1 -> 2 GCNConv layers).

    `ops` holds the pre-padded / pre-cast static operands from
    prepare_static_operands (hoisted per graph / per checkpoint)."""
    a = ops["a"]
    w0, w1 = ops["w0"], ops["w1"]
    b0, b1 = ops["b0"], ops["b1"]
    scale, shift = ops["scale"], ops["shift"]

    n_pad = a.shape[0]
    fin_pad = w0.shape[0]
    h_pad = w0.shape[1]
    o_pad = w1.shape[1]

    # Only the dynamic input x is padded/cast per forward.
    x_p = _pad2(x.astype(jnp.bfloat16), n_pad, fin_pad)

    # Layer 0 feature transform: XW0 once (never recomputed in the contraction).
    xw0 = linear(x_p, w0)                                   # [n_pad, h_pad] bf16

    if h_pad <= 1024 and o_pad <= 1024:
        # Fused: layer-0 aggregation + bias + BN + ReLU + (h @ W1) in one kernel
        # epilogue -> no [n_pad, h_pad] intermediate in HBM.
        xw1 = gcn_aggregate_fused(a, xw0, b0, scale, shift, w1)
    else:
        # Fallback for very wide hidden/out: unfused path.
        h = gcn_aggregate(a, xw0, b0, scale, shift, out_dtype=jnp.bfloat16)
        xw1 = linear(h, w1)
    # Dropout is identity in eval mode.

    # Layer 1 aggregation + bias (full-width feature tile, A streams once).
    out = gcn_aggregate(a, xw1, b1, out_dtype=jnp.float32)  # [n_pad, o_pad] f32

    return out[:num_nodes, :out_channels]


def init_params(key, in_channels, hidden_channels, out_channels):
    k0, k1 = jax.random.split(key)
    # Glorot-style deterministic init for the two GCNConv weight matrices.
    w0 = jax.random.normal(k0, (in_channels, hidden_channels), jnp.float32)
    w0 = w0 * (1.0 / jnp.sqrt(jnp.float32(in_channels)))
    b0 = jnp.zeros((hidden_channels,), jnp.float32)
    w1 = jax.random.normal(k1, (hidden_channels, out_channels), jnp.float32)
    w1 = w1 * (1.0 / jnp.sqrt(jnp.float32(hidden_channels)))
    b1 = jnp.zeros((out_channels,), jnp.float32)
    # BatchNorm defaults: gamma=1, beta=0, running_mean=0, running_var=1.
    gamma = jnp.ones((hidden_channels,), jnp.float32)
    beta = jnp.zeros((hidden_channels,), jnp.float32)
    rmean = jnp.zeros((hidden_channels,), jnp.float32)
    rvar = jnp.ones((hidden_channels,), jnp.float32)
    eps = jnp.float32(1e-5)
    return (w0, b0), (gamma, beta, rmean, rvar, eps), (w1, b1)


if __name__ == "__main__":
    key = jax.random.PRNGKey(0)
    k_x, k_p = jax.random.split(key)

    num_nodes = 16
    in_channels = 8
    hidden_channels = 32
    out_channels = 16

    # Deterministic node features.
    x = jax.random.normal(k_x, (num_nodes, in_channels), jnp.float32)

    # Deterministic small graph: undirected ring.
    src = jnp.arange(num_nodes, dtype=jnp.int32)
    dst = (src + 1) % num_nodes
    edge_index = jnp.stack(
        [jnp.concatenate([src, dst]), jnp.concatenate([dst, src])], axis=0)

    params = init_params(k_p, in_channels, hidden_channels, out_channels)

    # Normalized adjacency + all padding/bf16 casts of static operands are
    # hoisted out of the per-forward path (fixed graph / fixed weights).
    a_norm = normalized_adjacency(edge_index, num_nodes)
    ops = prepare_static_operands(a_norm, params)
    ops = jax.block_until_ready(ops)

    out = gcn_encoder_forward(x, ops, num_nodes=num_nodes,
                              out_channels=out_channels)
    jax.block_until_ready(out)
    assert out.shape == (num_nodes, out_channels)
    assert bool(jnp.all(jnp.isfinite(out)))
    print("KERNEL_OK")
</pallas_src>

<mosaic_0001>
module attributes {stable_mosaic.version = 11 : i64} {
  func.func @linear_kernel(%arg0: i32, %arg1: i32, %arg2: memref<128x128xbf16, #tpu.memory_space<vmem>>, %arg3: memref<128x128xbf16, #tpu.memory_space<vmem>>, %arg4: memref<128x128xbf16, #tpu.memory_space<vmem>>) attributes {dimension_semantics = [#tpu.dimension_semantics<parallel>, #tpu.dimension_semantics<parallel>], iteration_bounds = array<i64: 2, 1>, scalar_prefetch = 0 : i64, scratch_operands = 0 : i64, tpu.core_type = #tpu.core_type<tc>, window_params = [{transform_indices = @transform_0, window_bounds = array<i64: 128, 128>}, {transform_indices = @transform_1, window_bounds = array<i64: 128, 128>}, {transform_indices = @transform_2, window_bounds = array<i64: 128, 128>}]} {
    %c0 = arith.constant 0 : index
    %c0_0 = arith.constant 0 : index
    %0 = vector.load %arg2[%c0, %c0_0] : memref<128x128xbf16, #tpu.memory_space<vmem>>, vector<128x128xbf16>
    %c0_1 = arith.constant 0 : index
    %c0_2 = arith.constant 0 : index
    %1 = vector.load %arg3[%c0_1, %c0_2] : memref<128x128xbf16, #tpu.memory_space<vmem>>, vector<128x128xbf16>
    %cst = arith.constant dense<0.000000e+00> : vector<128x128xf32>
    %2 = tpu.matmul %0, %1, %cst {dimension_numbers = #tpu.dot_dimension_numbers<[1], [0], [0], [1], [0, 0, 1, 1], [], []>} : vector<128x128xbf16>, vector<128x128xbf16>, vector<128x128xf32> -> vector<128x128xf32>
    %3 = arith.truncf %2 : vector<128x128xf32> to vector<128x128xbf16>
    %c0_3 = arith.constant 0 : index
    %c0_4 = arith.constant 0 : index
    %4 = vector.load %arg4[%c0_3, %c0_4] : memref<128x128xbf16, #tpu.memory_space<vmem>>, vector<128x128xbf16>
    tpu.vector_store %arg4[%c0_3, %c0_4], %3 {strides = array<i32>} : memref<128x128xbf16, #tpu.memory_space<vmem>>, vector<128x128xbf16>,
    return
  }
  func.func @transform_0(%arg0: i32, %arg1: i32) -> (i32, i32) {
    %c0_i32 = arith.constant 0 : i32
    %c0_i32_0 = arith.constant 0 : i32
    return %arg0, %c0_i32 : i32, i32
  }
  func.func @transform_1(%arg0: i32, %arg1: i32) -> (i32, i32) {
    %c0_i32 = arith.constant 0 : i32
    %c0_i32_0 = arith.constant 0 : i32
    return %c0_i32, %arg1 : i32, i32
  }
  func.func @transform_2(%arg0: i32, %arg1: i32) -> (i32, i32) {
    %c0_i32 = arith.constant 0 : i32
    return %arg0, %arg1 : i32, i32
  }
}

module attributes {stable_mosaic.version = 11 : i64} {
  func.func @aggregate_bias_kernel(%arg0: i32, %arg1: i32, %arg2: i32, %arg3: memref<128x256xbf16, #tpu.memory_space<vmem>>, %arg4: memref<256x128xbf16, #tpu.memory_space<vmem>>, %arg5: memref<1x128xf32, #tpu.memory_space<vmem>>, %arg6: memref<128x128xf32, #tpu.memory_space<vmem>>, %arg7: memref<128x128xf32, #tpu.memory_space<vmem>>) attributes {dimension_semantics = [#tpu.dimension_semantics<parallel>, #tpu.dimension_semantics<parallel>, #tpu.dimension_semantics<arbitrary>], iteration_bounds = array<i64: 2, 1, 1>, scalar_prefetch = 0 : i64, scratch_operands = 1 : i64, tpu.core_type = #tpu.core_type<tc>, window_params = [{transform_indices = @transform_0, window_bounds = array<i64: 128, 256>}, {transform_indices = @transform_1, window_bounds = array<i64: 256, 128>}, {transform_indices = @transform_2, window_bounds = array<i64: 1, 128>}, {transform_indices = @transform_3, window_bounds = array<i64: 128, 128>}]} {
    %c0_i32 = arith.constant 0 : i32
    %0 = arith.cmpi eq, %arg2, %c0_i32 : i32
    %1 = arith.extui %0 : i1 to i32
    %c0_i32_0 = arith.constant 0 : i32
    %2 = arith.cmpi ne, %1, %c0_i32_0 : i32
    scf.if %2 {
      %cst_10 = arith.constant 0.000000e+00 : f32
      %12 = vector.broadcast %cst_10 : f32 to vector<128x128xf32>
      %c0_11 = arith.constant 0 : index
      %c0_12 = arith.constant 0 : index
      %13 = vector.load %arg7[%c0_11, %c0_12] : memref<128x128xf32, #tpu.memory_space<vmem>>, vector<128x128xf32>
      tpu.vector_store %arg7[%c0_11, %c0_12], %12 {strides = array<i32>} : memref<128x128xf32, #tpu.memory_space<vmem>>, vector<128x128xf32>,
    } else {
    }
    %c0 = arith.constant 0 : index
    %c0_1 = arith.constant 0 : index
    %3 = vector.load %arg7[%c0, %c0_1] : memref<128x128xf32, #tpu.memory_space<vmem>>, vector<128x128xf32>
    %c0_2 = arith.constant 0 : index
    %c0_3 = arith.constant 0 : index
    %4 = vector.load %arg3[%c0_2, %c0_3] : memref<128x256xbf16, #tpu.memory_space<vmem>>, vector<128x256xbf16>
    %c0_4 = arith.constant 0 : index
    %c0_5 = arith.constant 0 : index
    %5 = vector.load %arg4[%c0_4, %c0_5] : memref<256x128xbf16, #tpu.memory_space<vmem>>, vector<256x128xbf16>
    %cst = arith.constant dense<0.000000e+00> : vector<128x128xf32>
    %6 = tpu.matmul %4, %5, %cst {dimension_numbers = #tpu.dot_dimension_numbers<[1], [0], [0], [1], [0, 0, 1, 1], [], []>} : vector<128x256xbf16>, vector<256x128xbf16>, vector<128x128xf32> -> vector<128x128xf32>
    %7 = arith.addf %3, %6 : vector<128x128xf32>
    %c0_6 = arith.constant 0 : index
    %c0_7 = arith.constant 0 : index
    %8 = vector.load %arg7[%c0_6, %c0_7] : memref<128x128xf32, #tpu.memory_space<vmem>>, vector<128x128xf32>
    tpu.vector_store %arg7[%c0_6, %c0_7], %7 {strides = array<i32>} : memref<128x128xf32, #tpu.memory_space<vmem>>, vector<128x128xf32>,
    %c0_i32_8 = arith.constant 0 : i32
    %9 = arith.cmpi eq, %arg2, %c0_i32_8 : i32
    %10 = arith.extui %9 : i1 to i32
    %c0_i32_9 = arith.constant 0 : i32
    %11 = arith.cmpi ne, %10, %c0_i32_9 : i32
    scf.if %11 {
      %c0_10 = arith.constant 0 : index
      %c0_11 = arith.constant 0 : index
      %12 = vector.load %arg7[%c0_10, %c0_11] : memref<128x128xf32, #tpu.memory_space<vmem>>, vector<128x128xf32>
      %c0_12 = arith.constant 0 : index
      %c0_13 = arith.constant 0 : index
      %13 = vector.load %arg5[%c0_12, %c0_13] : memref<1x128xf32, #tpu.memory_space<vmem>>, vector<1x128xf32>
      %14 = vector.broadcast %13 : vector<1x128xf32> to vector<128x128xf32>
      %15 = arith.addf %12, %14 : vector<128x128xf32>
      %c0_14 = arith.constant 0 : index
      %c0_15 = arith.constant 0 : index
      %16 = vector.load %arg6[%c0_14, %c0_15] : memref<128x128xf32, #tpu.memory_space<vmem>>, vector<128x128xf32>
      tpu.vector_store %arg6[%c0_14, %c0_15], %15 {strides = array<i32>} : memref<128x128xf32, #tpu.memory_space<vmem>>, vector<128x128xf32>,
    } else {
    }
    return
  }
  func.func @transform_0(%arg0: i32, %arg1: i32, %arg2: i32) -> (i32, i32) {
    %c0_i32 = arith.constant 0 : i32
    return %arg0, %arg2 : i32, i32
  }
  func.func @transform_1(%arg0: i32, %arg1: i32, %arg2: i32) -> (i32, i32) {
    %c0_i32 = arith.constant 0 : i32
    return %arg2, %arg1 : i32, i32
  }
  func.func @transform_2(%arg0: i32, %arg1: i32, %arg2: i32) -> (i32, i32) {
    %c0_i32 = arith.constant 0 : i32
    %c0_i32_0 = arith.constant 0 : i32
    return %c0_i32, %arg1 : i32, i32
  }
  func.func @transform_3(%arg0: i32, %arg1: i32, %arg2: i32) -> (i32, i32) {
    %c0_i32 = arith.constant 0 : i32
    return %arg0, %arg1 : i32, i32
  }
}

module attributes {stable_mosaic.version = 11 : i64} {
  func.func @agg_fused_kernel(%arg0: i32, %arg1: i32, %arg2: memref<128x256xbf16, #tpu.memory_space<vmem>>, %arg3: memref<256x128xbf16, #tpu.memory_space<vmem>>, %arg4: memref<1x128xf32, #tpu.memory_space<vmem>>, %arg5: memref<1x128xf32, #tpu.memory_space<vmem>>, %arg6: memref<1x128xf32, #tpu.memory_space<vmem>>, %arg7: memref<128x128xbf16, #tpu.memory_space<vmem>>, %arg8: memref<128x128xbf16, #tpu.memory_space<vmem>>, %arg9: memref<128x128xf32, #tpu.memory_space<vmem>>) attributes {dimension_semantics = [#tpu.dimension_semantics<parallel>, #tpu.dimension_semantics<arbitrary>], iteration_bounds = array<i64: 2, 1>, scalar_prefetch = 0 : i64, scratch_operands = 1 : i64, tpu.core_type = #tpu.core_type<tc>, window_params = [{transform_indices = @transform_0, window_bounds = array<i64: 128, 256>}, {transform_indices = @transform_1, window_bounds = array<i64: 256, 128>}, {pipeline_mode = #tpu.pipeline_mode<synchronous>, transform_indices = @transform_2, window_bounds = array<i64: 1, 128>}, {pipeline_mode = #tpu.pipeline_mode<synchronous>, transform_indices = @transform_3, window_bounds = array<i64: 1, 128>}, {pipeline_mode = #tpu.pipeline_mode<synchronous>, transform_indices = @transform_4, window_bounds = array<i64: 1, 128>}, {pipeline_mode = #tpu.pipeline_mode<synchronous>, transform_indices = @transform_5, window_bounds = array<i64: 128, 128>}, {transform_indices = @transform_6, window_bounds = array<i64: 128, 128>}]} {
    %c0_i32 = arith.constant 0 : i32
    %0 = arith.cmpi eq, %arg1, %c0_i32 : i32
    %1 = arith.extui %0 : i1 to i32
    %c0_i32_0 = arith.constant 0 : i32
    %2 = arith.cmpi ne, %1, %c0_i32_0 : i32
    scf.if %2 {
      %cst_10 = arith.constant 0.000000e+00 : f32
      %12 = vector.broadcast %cst_10 : f32 to vector<128x128xf32>
      %c0_11 = arith.constant 0 : index
      %c0_12 = arith.constant 0 : index
      %13 = vector.load %arg9[%c0_11, %c0_12] : memref<128x128xf32, #tpu.memory_space<vmem>>, vector<128x128xf32>
      tpu.vector_store %arg9[%c0_11, %c0_12], %12 {strides = array<i32>} : memref<128x128xf32, #tpu.memory_space<vmem>>, vector<128x128xf32>,
    } else {
    }
    %c0 = arith.constant 0 : index
    %c0_1 = arith.constant 0 : index
    %3 = vector.load %arg9[%c0, %c0_1] : memref<128x128xf32, #tpu.memory_space<vmem>>, vector<128x128xf32>
    %c0_2 = arith.constant 0 : index
    %c0_3 = arith.constant 0 : index
    %4 = vector.load %arg2[%c0_2, %c0_3] : memref<128x256xbf16, #tpu.memory_space<vmem>>, vector<128x256xbf16>
    %c0_4 = arith.constant 0 : index
    %c0_5 = arith.constant 0 : index
    %5 = vector.load %arg3[%c0_4, %c0_5] : memref<256x128xbf16, #tpu.memory_space<vmem>>, vector<256x128xbf16>
    %cst = arith.constant dense<0.000000e+00> : vector<128x128xf32>
    %6 = tpu.matmul %4, %5, %cst {dimension_numbers = #tpu.dot_dimension_numbers<[1], [0], [0], [1], [0, 0, 1, 1], [], []>} : vector<128x256xbf16>, vector<256x128xbf16>, vector<128x128xf32> -> vector<128x128xf32>
    %7 = arith.addf %3, %6 : vector<128x128xf32>
    %c0_6 = arith.constant 0 : index
    %c0_7 = arith.constant 0 : index
    %8 = vector.load %arg9[%c0_6, %c0_7] : memref<128x128xf32, #tpu.memory_space<vmem>>, vector<128x128xf32>
    tpu.vector_store %arg9[%c0_6, %c0_7], %7 {strides = array<i32>} : memref<128x128xf32, #tpu.memory_space<vmem>>, vector<128x128xf32>,
    %c0_i32_8 = arith.constant 0 : i32
    %9 = arith.cmpi eq, %arg1, %c0_i32_8 : i32
    %10 = arith.extui %9 : i1 to i32
    %c0_i32_9 = arith.constant 0 : i32
    %11 = arith.cmpi ne, %10, %c0_i32_9 : i32
    scf.if %11 {
      %c0_10 = arith.constant 0 : index
      %c0_11 = arith.constant 0 : index
      %12 = vector.load %arg9[%c0_10, %c0_11] : memref<128x128xf32, #tpu.memory_space<vmem>>, vector<128x128xf32>
      %c0_12 = arith.constant 0 : index
      %c0_13 = arith.constant 0 : index
      %13 = vector.load %arg4[%c0_12, %c0_13] : memref<1x128xf32, #tpu.memory_space<vmem>>, vector<1x128xf32>
      %14 = vector.broadcast %13 : vector<1x128xf32> to vector<128x128xf32>
      %15 = arith.addf %12, %14 : vector<128x128xf32>
      %c0_14 = arith.constant 0 : index
      %c0_15 = arith.constant 0 : index
      %16 = vector.load %arg5[%c0_14, %c0_15] : memref<1x128xf32, #tpu.memory_space<vmem>>, vector<1x128xf32>
      %17 = vector.broadcast %16 : vector<1x128xf32> to vector<128x128xf32>
      %18 = arith.mulf %15, %17 : vector<128x128xf32>
      %c0_16 = arith.constant 0 : index
      %c0_17 = arith.constant 0 : index
      %19 = vector.load %arg6[%c0_16, %c0_17] : memref<1x128xf32, #tpu.memory_space<vmem>>, vector<1x128xf32>
      %20 = vector.broadcast %19 : vector<1x128xf32> to vector<128x128xf32>
      %21 = arith.addf %18, %20 : vector<128x128xf32>
      %cst_18 = arith.constant 0.000000e+00 : f32
      %22 = vector.broadcast %cst_18 : f32 to vector<128x128xf32>
      %23 = arith.maximumf %21, %22 : vector<128x128xf32>
      %24 = arith.truncf %23 : vector<128x128xf32> to vector<128x128xbf16>
      %c0_19 = arith.constant 0 : index
      %c0_20 = arith.constant 0 : index
      %25 = vector.load %arg7[%c0_19, %c0_20] : memref<128x128xbf16, #tpu.memory_space<vmem>>, vector<128x128xbf16>
      %cst_21 = arith.constant dense<0.000000e+00> : vector<128x128xf32>
      %26 = tpu.matmul %24, %25, %cst_21 {dimension_numbers = #tpu.dot_dimension_numbers<[1], [0], [0], [1], [0, 0, 1, 1], [], []>} : vector<128x128xbf16>, vector<128x128xbf16>, vector<128x128xf32> -> vector<128x128xf32>
      %27 = arith.truncf %26 : vector<128x128xf32> to vector<128x128xbf16>
      %c0_22 = arith.constant 0 : index
      %c0_23 = arith.constant 0 : index
      %28 = vector.load %arg8[%c0_22, %c0_23] : memref<128x128xbf16, #tpu.memory_space<vmem>>, vector<128x128xbf16>
      tpu.vector_store %arg8[%c0_22, %c0_23], %27 {strides = array<i32>} : memref<128x128xbf16, #tpu.memory_space<vmem>>, vector<128x128xbf16>,
    } else {
    }
    return
  }
  func.func @transform_0(%arg0: i32, %arg1: i32) -> (i32, i32) {
    %c0_i32 = arith.constant 0 : i32
    return %arg0, %arg1 : i32, i32
  }
  func.func @transform_1(%arg0: i32, %arg1: i32) -> (i32, i32) {
    %c0_i32 = arith.constant 0 : i32
    %c0_i32_0 = arith.constant 0 : i32
    return %arg1, %c0_i32 : i32, i32
  }
  func.func @transform_2(%arg0: i32, %arg1: i32) -> (i32, i32) {
    %c0_i32 = arith.constant 0 : i32
    %c0_i32_0 = arith.constant 0 : i32
    %c0_i32_1 = arith.constant 0 : i32
    return %c0_i32, %c0_i32_0 : i32, i32
  }
  func.func @transform_3(%arg0: i32, %arg1: i32) -> (i32, i32) {
    %c0_i32 = arith.constant 0 : i32
    %c0_i32_0 = arith.constant 0 : i32
    %c0_i32_1 = arith.constant 0 : i32
    return %c0_i32, %c0_i32_0 : i32, i32
  }
  func.func @transform_4(%arg0: i32, %arg1: i32) -> (i32, i32) {
    %c0_i32 = arith.constant 0 : i32
    %c0_i32_0 = arith.constant 0 : i32
    %c0_i32_1 = arith.constant 0 : i32
    return %c0_i32, %c0_i32_0 : i32, i32
  }
  func.func @transform_5(%arg0: i32, %arg1: i32) -> (i32, i32) {
    %c0_i32 = arith.constant 0 : i32
    %c0_i32_0 = arith.constant 0 : i32
    %c0_i32_1 = arith.constant 0 : i32
    return %c0_i32, %c0_i32_0 : i32, i32
  }
  func.func @transform_6(%arg0: i32, %arg1: i32) -> (i32, i32) {
    %c0_i32 = arith.constant 0 : i32
    %c0_i32_0 = arith.constant 0 : i32
    return %arg0, %c0_i32 : i32, i32
  }
}

</mosaic_0001>

<bundles_post_ra>
// kernel: gcn_encoder_forward.3
= control target key start
LH: loop header
LB: loop body
LE: loop exit
PB: predicated region body
PF: predicated region fallthrough
CT: control target
= control target key end

     0   :  { %7 = vsyncpa [#allocation3], 0  ;;  %s883_s9 = smov 0   ;;  %s885_s10 = smov 0   ;;  %s975_s0 = inlined_call_operand.vmem [shape: bf16[256,128], index: 0, kind: input, shape index: {}]   ;;  %s976_s1 = inlined_call_operand.hbm [shape: bf16[128,128], index: 1, kind: input, shape index: {}]   ;;  %s977_s2 = inlined_call_operand.vmem [shape: bf16[256,128], index: 2, kind: output, shape index: {}]  }
   0x1   :  { %s887_s11 = smov 0  }
   0x2 LB: > { %s584_s12 = sadd.s32 4294967295, %s863_s11   ;;  %s25_s13 = sadd.s32 1, %s859_s10  ;;  %s863_s11 = sphi %s887_s11, %s13_s11   ;;  %s859_s10 = sphi %s885_s10, %s987_s10   ;;  %s855_s9 = sphi %s883_s9, %s986_s9  }
   0x3   : > { %p27_p0 = scmp.ge.s32.totalorder %s25_s13, 2  ;;  %p586_p1 = scmp.ge.s32.totalorder %s863_s11, 1 }
   0x4   : > { %p110_p2 = scmp.lt.s32.totalorder %s863_s11, 3  ;;  %p908_p4 = scmp.eq.s32.totalorder %s584_s12, 0 }
   0x5   : > { %s989_s13 = smov (%p27_p0, %s25_s13), 0  ;;  %s865_s16 = smov [#allocation2]  }
   0x6   : > { %p904_p3 = pnand %p586_p1, %p110_p2  ;;  %s124_s17 = sshll.u32 %s865_s16, 4  ;;  %s125_s17 = int_to_ptr.vmem [resolvable:$true] %s124_s17 }
   0x7   : > { %s982_s15 = scalar_select %p908_p4, 1, 0 }
   0x8   : > { %s981_s14 = scalar_select %p904_p3, 1, 0 }
   0x9   : > { %p760_p5 = pneg %p904_p3  ;;  %s809_s21 = scalar_lea.hbm %s976_s1, 1024 }
   0xa   : > { %p810_p7 = scmp.ne.s32.totalorder %s976_s1, %s809_s21  ;;  %p816_p11 = scmp.lt.u32.totalorder %s809_s21, %s976_s1 }
   0xb   : > { %p916_p6 = pnand %p908_p4, %p760_p5 }
   0xd   : > { %p811_p8 = pneg %p916_p6 }
   0xf   : > { %p812_p9 = pnand %p811_p8, %p810_p7 }
  0x11   : > { %p813_p10 = pneg %p812_p9 }
  0x13   : > { %p818_p12 = pnand %p816_p11, %p813_p10 }
  0x15   : > { %821 = shalt.err (!%p818_p12)
}
  0x16   : > { %s822_s26 = scalar_lea.vmem %s125_s17, 1024  ;;  %p830_p2 = scmp.lt.s32.totalorder %s125_s17, %s125_s17 }
  0x17   : > { %p823_p13 = scmp.ne.s32.totalorder %s125_s17, %s822_s26  ;;  %p831_p5 = scmp.lt.s32.totalorder %s822_s26, %s822_s26 }
  0x19   : > { %p825_p0 = pnand %p823_p13, %p811_p8  ;;  %p832_p4 = por %p831_p5, %p830_p2 }
  0x1b   : > { %p826_p1 = pneg %p825_p0 }
  0x1d   : > { %p833_p3 = pnand %p832_p4, %p826_p1 }
  0x1f   : > { %836 = shalt.err (!%p833_p3)
}
  0x20   : > { %s866_s27 = smov 64   ;;  %s867_s28 = smov 4  }
  0x21   : > { %763 = dma.hbm_to_vmem [thread:$0]  (!%p916_p6), %s976_s1, 1024, %s125_s17, [#allocation3], %s866_s27, %s866_s27, %s867_s28  }
  0x22   : > { %p984_p7 = scmp.ne.s32.totalorder %s981_s14, 0 }
  0x23   : > { %p985_p9 = scmp.ne.s32.totalorder (!%p984_p7), %s982_s15, 0 }
  0x24   : > { %149 = sbr.rel (%p984_p7) target bundleno = 303 (0x12f), region = 28 }
  0x2b   : > { %850 = dma.done.wait (%p985_p9), [#allocation3], 1024  }
  0x2c   : > { %852 = vsyncadd (%p985_p9), [#allocation3], 4294966272  ;;  %s591_s3 = sshll.u32 %s855_s9, 4  ;;  %v793_v0 = vld [vmem:[#allocation2] sm:$0xff]   ;;  %v794_v1 = vld [vmem:[#allocation2 + $0x8] sm:$0xff]  }
  0x2d   : > { %p175_p3 = scmp.lt.s32.totalorder %s591_s3, 31  ;;  %708 = vmatprep.subr.bf16.mxu0 %v793_v0  ;;  %740 = vmatprep.subr.bf16.mxu1 %v793_v0  ;;  %v795_v2 = vld [vmem:[#allocation2 + $0x10] sm:$0xff]   ;;  %v796_v3 = vld [vmem:[#allocation2 + $0x18] sm:$0xff]   ;;  %v797_v6 = vld [vmem:[#allocation2 + $0x20] sm:$0xff]  }
  0x2e   : > { %709 = vmatpush3.bf16.msra.mxu0 %v793_v0  ;;  %748 = vmatpush3.bf16.msra.mxu1 %v793_v0  ;;  %v798_v7 = vld [vmem:[#allocation2 + $0x28] sm:$0xff]   ;;  %v799_v8 = vld [vmem:[#allocation2 + $0x30] sm:$0xff]   ;;  %v800_v9 = vld [vmem:[#allocation2 + $0x38] sm:$0xff]  }
  0x2f   : > { %s991_s3 = smov (!%p175_p3, %s591_s3), 31  ;;  %710 = vmatprep.subr.bf16.mxu0 %v794_v1  ;;  %741 = vmatprep.subr.bf16.mxu1 %v794_v1 }
  0x30   : > { %s592_s4 = sshll.u32 %s991_s3, 2 }
  0x31   : > { %s951_s7 = scalar_lea.vmem %s975_s0, %s592_s4  ;;  %s187_s12 = scalar_lea.vmem %s977_s2, %s592_s4 }
  0x32   : > { %711 = vmatpush3.bf16.msra.mxu0 %v794_v1  ;;  %749 = vmatpush3.bf16.msra.mxu1 %v794_v1  ;;  %v801_v4 = vld [vmem:[%s951_s7] sm:$0xff]   ;;  %v803_v10 = vld [vmem:[%s951_s7 + $0x8] sm:$0xff]   ;;  %v805_v12 = vld [vmem:[%s951_s7 + $0x10] sm:$0xff]  }
  0x33   : > { %712 = vmatprep.subr.bf16.mxu0 %v795_v2  ;;  %742 = vmatprep.subr.bf16.mxu1 %v795_v2  ;;  %v802_v5 = vld [vmem:[%s951_s7 + $0x20] sm:$0xff]   ;;  %v804_v11 = vld [vmem:[%s951_s7 + $0x28] sm:$0xff]   ;;  %v806_v13 = vld [vmem:[%s951_s7 + $0x30] sm:$0xff]  }
  0x34   : > { %724 = vmatprep.mubr.bf16.mxu0 %v801_v4  ;;  %732 = vmatprep.mubr.bf16.mxu1 %v802_v5  ;;  %v807_v14 = vld [vmem:[%s951_s7 + $0x18] sm:$0xff]  }
  0x35   : > { %v808_v15 = vld [vmem:[%s951_s7 + $0x38] sm:$0xff]  }
  0x36   : > { %713 = vmatpush3.bf16.msra.mxu0 %v795_v2  ;;  %750 = vmatpush3.bf16.msra.mxu1 %v795_v2 }
  0x37   : > { %714 = vmatprep.subr.bf16.mxu0 %v796_v3  ;;  %743 = vmatprep.subr.bf16.mxu1 %v796_v3 }
  0x3a   : > { %715 = vmatpush3.bf16.msra.mxu0 %v796_v3  ;;  %751 = vmatpush3.bf16.msra.mxu1 %v796_v3 }
  0x3b   : > { %716 = vmatprep.subr.bf16.mxu0 %v797_v6  ;;  %744 = vmatprep.subr.bf16.mxu1 %v797_v6 }
  0x3e   : > { %717 = vmatpush3.bf16.msra.mxu0 %v797_v6  ;;  %752 = vmatpush3.bf16.msra.mxu1 %v797_v6 }
  0x3f   : > { %718 = vmatprep.subr.bf16.mxu0 %v798_v7  ;;  %745 = vmatprep.subr.bf16.mxu1 %v798_v7 }
  0x42   : > { %719 = vmatpush3.bf16.msra.mxu0 %v798_v7  ;;  %753 = vmatpush3.bf16.msra.mxu1 %v798_v7 }
  0x43   : > { %720 = vmatprep.subr.bf16.mxu0 %v799_v8  ;;  %746 = vmatprep.subr.bf16.mxu1 %v799_v8 }
  0x46   : > { %721 = vmatpush3.bf16.msra.mxu0 %v799_v8  ;;  %754 = vmatpush3.bf16.msra.mxu1 %v799_v8 }
  0x47   : > { %722 = vmatprep.subr.bf16.mxu0 %v800_v9  ;;  %747 = vmatprep.subr.bf16.mxu1 %v800_v9 }
  0x4a   : > { %723 = vmatpush3.bf16.msra.mxu0 %v800_v9  ;;  %755 = vmatpush3.bf16.msra.mxu1 %v800_v9 }
  0x4d   : > { %725 = vmatmul.mubr.bf16.vlgmr.msra.gmra.mrb[0].mxu0 %v803_v10  ;;  %733 = vmatmul.mubr.bf16.vlgmr.msra.gmra.mrb[0].mxu1 %v804_v11 }
  0x4e   : > { %728 = vmatprep.mubr.bf16.mxu0 %v805_v12  ;;  %736 = vmatprep.mubr.bf16.mxu1 %v806_v13 }
  0x55   : > { %729 = vmatmul.mubr.bf16.gmra.mrb[4].mxu0 %v807_v14  ;;  %737 = vmatmul.mubr.bf16.gmra.mrb[4].mxu1 %v808_v15 }
 0x120   : > { %v726_v16 = vpop.f32.mrb[0].mxu0  ;;  %v734_v17 = vpop.f32.mrb[0].mxu1 }
 0x121   : > { %v352_v18 = vpop.f32.mrb[1].mxu0  ;;  %v384_v19 = vpop.f32.mrb[1].mxu1 }
 0x122   : > { %v727_v20 = vpop.f32.mrb[2].mxu0  ;;  %v735_v21 = vpop.f32.mrb[2].mxu1 }
 0x123   : > { %v653_v22 = vpack.c.bf16 %v727_v20, %v726_v16  ;;  %v673_v23 = vpack.c.bf16 %v735_v21, %v734_v17  ;;  %v355_v24 = vpop.f32.mrb[3].mxu0  ;;  %v387_v25 = vpop.f32.mrb[3].mxu1 }
 0x124   : > { %v648_v26 = vpack.c.bf16 %v355_v24, %v352_v18  ;;  %v668_v27 = vpack.c.bf16 %v387_v25, %v384_v19 }
 0x125   : > { %685 = vst [vmem:[%s187_s12 + $0x8] sm:$0xff] %v653_v22   ;;  %689 = vst [vmem:[%s187_s12 + $0x28] sm:$0xff] %v673_v23  }
 0x126   : > { %649 = vst [vmem:[%s187_s12] sm:$0xff] %v648_v26   ;;  %688 = vst [vmem:[%s187_s12 + $0x20] sm:$0xff] %v668_v27  }
 0x128   : > { %v730_v28 = vpop.f32.mrb[4].mxu0  ;;  %v738_v29 = vpop.f32.mrb[4].mxu1 }
 0x129   : > { %v368_v30 = vpop.f32.mrb[5].mxu0  ;;  %v400_v31 = vpop.f32.mrb[5].mxu1 }
 0x12a   : > { %v731_v32 = vpop.f32.mrb[6].mxu0  ;;  %v739_v33 = vpop.f32.mrb[6].mxu1 }
 0x12b   : > { %v663_v34 = vpack.c.bf16 %v731_v32, %v730_v28  ;;  %v683_v35 = vpack.c.bf16 %v739_v33, %v738_v29  ;;  %v371_v36 = vpop.f32.mrb[7].mxu0  ;;  %v403_v37 = vpop.f32.mrb[7].mxu1 }
 0x12c   : > { %v658_v38 = vpack.c.bf16 %v371_v36, %v368_v30  ;;  %v678_v39 = vpack.c.bf16 %v403_v37, %v400_v31 }
 0x12d   : > { %687 = vst [vmem:[%s187_s12 + $0x18] sm:$0xff] %v663_v34   ;;  %691 = vst [vmem:[%s187_s12 + $0x38] sm:$0xff] %v683_v35  }
 0x12e   : > { %686 = vst [vmem:[%s187_s12 + $0x10] sm:$0xff] %v658_v38   ;;  %690 = vst [vmem:[%s187_s12 + $0x30] sm:$0xff] %v678_v39  }
 0x12f PF: > { %s13_s11 = sadd.s32 1, %s863_s11   ;;  %s986_s9 = smov %s859_s10 }
 0x130   : > { %p10_p4 = scmp.ge.s32.totalorder %s13_s11, 4   ;;  %s987_s10 = smov %s989_s13 }
 0x132   :  { %12 = sbr.rel (!%p10_p4) target bundleno = 2 (0x2), region = 64 }
 0x139   :  { %523 = vsyncpa [#allocation3], 1 }
 0x13a   :  { %525 = vsyncpa [#allocation3 + $0x1], 1 }

// kernel: gcn_encoder_forward.5
= control target key start
LH: loop header
LB: loop body
LE: loop exit
PB: predicated region body
PF: predicated region fallthrough
CT: control target
= control target key end

     0   :  { %s1065_s12 = smov 0   ;;  %s1067_s13 = smov 0   ;;  %s1210_s0 = inlined_call_operand.vmem [shape: bf16[256,256], index: 0, kind: input, shape index: {}]   ;;  %s1211_s1 = inlined_call_operand.vmem [shape: bf16[256,128], index: 1, kind: input, shape index: {}]   ;;  %s1212_s2 = inlined_call_operand.vmem [shape: f32[1,128], index: 2, kind: input, shape index: {}]   ;;  %s1213_s3 = inlined_call_operand.vmem [shape: f32[256,128], index: 3, kind: output, shape index: {}]  }
   0x1   :  { %s1069_s14 = smov 0  }
   0x2 LB: > { %s32_s15 = sadd.s32 1, %s1039_s13  ;;  %p835_p0 = scmp.ge.s32.totalorder %s1043_s14, 1  ;;  %s1043_s14 = sphi %s1069_s14, %s13_s14   ;;  %s1039_s13 = sphi %s1067_s13, %s1215_s13   ;;  %s1035_s12 = sphi %s1065_s12, %s1214_s12  }
   0x3   : > { %p34_p1 = scmp.ge.s32.totalorder %s32_s15, 2  ;;  %p191_p2 = scmp.lt.s32.totalorder %s1043_s14, 3 }
   0x5   : > { %s1217_s15 = smov (%p34_p1, %s32_s15), 0  ;;  %p192_p3 = pnand %p835_p0, %p191_p2 }
   0x6   : > { %v981_v0 = vld [vmem:[%s1211_s1 + $0x40] sm:$0xff] (!%p192_p3)   ;;  %s836_s18 = sshll.u32 (!%p192_p3), %s1035_s12, 4  ;;  %v983_v2 = vld [vmem:[%s1211_s1 + $0x48] sm:$0xff] (!%p192_p3)   ;;  %v985_v4 = vld [vmem:[%s1211_s1 + $0x50] sm:$0xff] (!%p192_p3)  }
   0x7   : > { %195 = sbr.rel (%p192_p3) target bundleno = 283 (0x11b), region = 32  ;;  %v982_v1 = vld [vmem:[%s1211_s1] sm:$0xff] (!%p192_p3)   ;;  %877 = vmatprep.subr.bf16.mxu0 (!%p192_p3), %v981_v0  ;;  %941 = vmatprep.subr.bf16.mxu1 (!%p192_p3), %v981_v0  ;;  %v984_v3 = vld [vmem:[%s1211_s1 + $0x8] sm:$0xff] (!%p192_p3)   ;;  %p236_p4 = scmp.lt.s32.totalorder (!%p192_p3), %s836_s18, 31  ;;  %v986_v5 = vld [vmem:[%s1211_s1 + $0x10] sm:$0xff] (!%p192_p3)  }
   0x8   : > { %878 = vmatpush3.bf16.msra.mxu0 (!%p192_p3), %v982_v1  ;;  %949 = vmatpush3.bf16.msra.mxu1 (!%p192_p3), %v982_v1  ;;  %v987_v6 = vld [vmem:[%s1211_s1 + $0x58] sm:$0xff] (!%p192_p3)   ;;  %v989_v8 = vld [vmem:[%s1211_s1 + $0x60] sm:$0xff] (!%p192_p3)   ;;  %v991_v10 = vld [vmem:[%s1211_s1 + $0x68] sm:$0xff] (!%p192_p3)  }
   0x9   : > { %879 = vmatprep.subr.bf16.mxu0 (!%p192_p3), %v983_v2  ;;  %942 = vmatprep.subr.bf16.mxu1 (!%p192_p3), %v983_v2  ;;  %v988_v7 = vld [vmem:[%s1211_s1 + $0x18] sm:$0xff] (!%p192_p3)   ;;  %v990_v9 = vld [vmem:[%s1211_s1 + $0x20] sm:$0xff] (!%p192_p3)   ;;  %v992_v13 = vld [vmem:[%s1211_s1 + $0x28] sm:$0xff] (!%p192_p3)  }
   0xa   : > { %v993_v14 = vld [vmem:[%s1211_s1 + $0x70] sm:$0xff] (!%p192_p3)   ;;  %v995_v16 = vld [vmem:[%s1211_s1 + $0x78] sm:$0xff] (!%p192_p3)   ;;  %v1160_v35 = vld [vmem:[%s1212_s2] ss:$0 sm:$0xff] (!%p192_p3) }
   0xb   : > { %v994_v15 = vld [vmem:[%s1211_s1 + $0x30] sm:$0xff] (!%p192_p3)   ;;  %v996_v17 = vld [vmem:[%s1211_s1 + $0x38] sm:$0xff] (!%p192_p3)  }
   0xc   : > { %880 = vmatpush3.bf16.msra.mxu0 (!%p192_p3), %v984_v3  ;;  %950 = vmatpush3.bf16.msra.mxu1 (!%p192_p3), %v984_v3 }
   0xd   : > { %881 = vmatprep.subr.bf16.mxu0 (!%p192_p3), %v985_v4  ;;  %943 = vmatprep.subr.bf16.mxu1 (!%p192_p3), %v985_v4 }
   0xe   : > { %s1219_s18 = smov (!%p236_p4, %s836_s18), 31 }
   0xf   : > { %s876_s6 = sshll.u32 %s1219_s18, 3 }
  0x10   : > { %882 = vmatpush3.bf16.msra.mxu0 %v986_v5  ;;  %951 = vmatpush3.bf16.msra.mxu1 %v986_v5  ;;  %s1118_s11 = scalar_lea.vmem %s1210_s0, %s876_s6  ;;  %s1167_s8 = scalar_lea.vmem %s1213_s3, %s876_s6 }
  0x11   : > { %883 = vmatprep.subr.bf16.mxu0 %v987_v6  ;;  %944 = vmatprep.subr.bf16.mxu1 %v987_v6  ;;  %v999_v11 = vld [vmem:[%s1118_s11 + $0x4] ss:$8 sps:$4 sm:$0xff]   ;;  %v997_v18 = vld [vmem:[%s1118_s11] ss:$8 sps:$4 sm:$0xff]   ;;  %v1003_v20 = vld [vmem:[%s1118_s11 + $0x14] ss:$8 sps:$4 sm:$0xff]  }
  0x12   : > { %v1002_v12 = vld [vmem:[%s1118_s11 + $0x44] ss:$8 sps:$4 sm:$0xff]   ;;  %560 = vmatprep.mubr.bf16.mxu0 %v999_v11  ;;  %v1000_v19 = vld [vmem:[%s1118_s11 + $0x40] ss:$8 sps:$4 sm:$0xff]   ;;  %v1005_v21 = vld [vmem:[%s1118_s11 + $0x54] ss:$8 sps:$4 sm:$0xff]  }
  0x13   : > { %592 = vmatprep.mubr.bf16.mxu1 %v1002_v12  ;;  %v1007_v22 = vld [vmem:[%s1118_s11 + $0x10] ss:$8 sps:$4 sm:$0xff]   ;;  %v1009_v24 = vld [vmem:[%s1118_s11 + $0x24] ss:$8 sps:$4 sm:$0xff]   ;;  %v1013_v26 = vld [vmem:[%s1118_s11 + $0x20] ss:$8 sps:$4 sm:$0xff]  }
  0x14   : > { %884 = vmatpush3.bf16.msra.mxu0 %v988_v7  ;;  %952 = vmatpush3.bf16.msra.mxu1 %v988_v7  ;;  %v1008_v23 = vld [vmem:[%s1118_s11 + $0x50] ss:$8 sps:$4 sm:$0xff]   ;;  %v1011_v25 = vld [vmem:[%s1118_s11 + $0x64] ss:$8 sps:$4 sm:$0xff]   ;;  %v1014_v27 = vld [vmem:[%s1118_s11 + $0x60] ss:$8 sps:$4 sm:$0xff]  }
  0x15   : > { %885 = vmatprep.subr.bf16.mxu0 %v989_v8  ;;  %945 = vmatprep.subr.bf16.mxu1 %v989_v8  ;;  %v1015_v28 = vld [vmem:[%s1118_s11 + $0x34] ss:$8 sps:$4 sm:$0xff]   ;;  %v1019_v30 = vld [vmem:[%s1118_s11 + $0x30] ss:$8 sps:$4 sm:$0xff]  }
  0x16   : > { %v1017_v29 = vld [vmem:[%s1118_s11 + $0x74] ss:$8 sps:$4 sm:$0xff]   ;;  %v1020_v31 = vld [vmem:[%s1118_s11 + $0x70] ss:$8 sps:$4 sm:$0xff]  }
  0x18   : > { %886 = vmatpush3.bf16.msra.mxu0 %v990_v9  ;;  %953 = vmatpush3.bf16.msra.mxu1 %v990_v9 }
  0x19   : > { %887 = vmatprep.subr.bf16.mxu0 %v991_v10  ;;  %946 = vmatprep.subr.bf16.mxu1 %v991_v10 }
  0x1c   : > { %888 = vmatpush3.bf16.msra.mxu0 %v992_v13  ;;  %954 = vmatpush3.bf16.msra.mxu1 %v992_v13 }
  0x1d   : > { %889 = vmatprep.subr.bf16.mxu0 %v993_v14  ;;  %947 = vmatprep.subr.bf16.mxu1 %v993_v14 }
  0x20   : > { %890 = vmatpush3.bf16.msra.mxu0 %v994_v15  ;;  %955 = vmatpush3.bf16.msra.mxu1 %v994_v15 }
  0x21   : > { %891 = vmatprep.subr.bf16.mxu0 %v995_v16  ;;  %948 = vmatprep.subr.bf16.mxu1 %v995_v16 }
  0x24   : > { %892 = vmatpush3.bf16.msra.mxu0 %v996_v17  ;;  %956 = vmatpush3.bf16.msra.mxu1 %v996_v17 }
  0x27   : > { %561 = vmatmul.mubr.bf16.vlgmr.msra.gmra.mrb[0].mxu0 %v997_v18  ;;  %593 = vmatmul.mubr.bf16.vlgmr.msra.gmra.mrb[0].mxu1 %v1000_v19 }
  0x28   : > { %568 = vmatprep.mubr.bf16.mxu0 %v1003_v20  ;;  %600 = vmatprep.mubr.bf16.mxu1 %v1005_v21 }
  0x2f   : > { %569 = vmatmul.mubr.bf16.gmra.mrb[4].mxu0 %v1007_v22  ;;  %601 = vmatmul.mubr.bf16.gmra.mrb[4].mxu1 %v1008_v23 }
  0x30   : > { %576 = vmatprep.mubr.bf16.mxu0 %v1009_v24  ;;  %608 = vmatprep.mubr.bf16.mxu1 %v1011_v25 }
  0x37   : > { %577 = vmatmul.mubr.bf16.gmra.mrb[8].mxu0 %v1013_v26  ;;  %609 = vmatmul.mubr.bf16.gmra.mrb[8].mxu1 %v1014_v27 }
  0x38   : > { %584 = vmatprep.mubr.bf16.mxu0 %v1015_v28  ;;  %616 = vmatprep.mubr.bf16.mxu1 %v1017_v29 }
  0x3f   : > { %585 = vmatmul.mubr.bf16.gmra.mrb[12].mxu0 %v1019_v30  ;;  %617 = vmatmul.mubr.bf16.gmra.mrb[12].mxu1 %v1020_v31 }
  0xfa   : > { %v893_v32 = vpop.f32.mrb[0].mxu0  ;;  %v917_v33 = vpop.f32.mrb[0].mxu1 }
  0xfb   : > { %v894_v34 = vpop.f32.mrb[1].mxu0  ;;  %v918_v36 = vpop.f32.mrb[1].mxu1 }
  0xfc   : > { %v895_v37 = vadd.f32 %v894_v34, %v893_v32  ;;  %v919_v38 = vadd.f32 %v918_v36, %v917_v33  ;;  %v896_v39 = vpop.f32.mrb[2].mxu0  ;;  %v920_v40 = vpop.f32.mrb[2].mxu1 }
  0xfd   : > { %v897_v41 = vpop.f32.mrb[3].mxu0  ;;  %v921_v42 = vpop.f32.mrb[3].mxu1 }
  0xfe   : > { %v683_v43 = vadd.f32 %v895_v37, %v1160_v35  ;;  %v691_v44 = vadd.f32 %v919_v38, %v1160_v35  ;;  %v898_v45 = vadd.f32 %v897_v41, %v896_v39  ;;  %v922_v46 = vadd.f32 %v921_v42, %v920_v40 }
 0x100   : > { %699 = vst [vmem:[%s1167_s8] sm:$0xff] %v683_v43  ;;  %707 = vst [vmem:[%s1167_s8 + $0x40] sm:$0xff] %v691_v44  ;;  %v684_v47 = vadd.f32 %v898_v45, %v1160_v35  ;;  %v692_v48 = vadd.f32 %v922_v46, %v1160_v35 }
 0x102   : > { %700 = vst [vmem:[%s1167_s8 + $0x8] sm:$0xff] %v684_v47  ;;  %708 = vst [vmem:[%s1167_s8 + $0x48] sm:$0xff] %v692_v48  ;;  %v899_v49 = vpop.f32.mrb[4].mxu0  ;;  %v923_v50 = vpop.f32.mrb[4].mxu1 }
 0x103   : > { %v900_v51 = vpop.f32.mrb[5].mxu0  ;;  %v924_v52 = vpop.f32.mrb[5].mxu1 }
 0x104   : > { %v901_v53 = vadd.f32 %v900_v51, %v899_v49  ;;  %v925_v54 = vadd.f32 %v924_v52, %v923_v50  ;;  %v902_v55 = vpop.f32.mrb[6].mxu0  ;;  %v926_v56 = vpop.f32.mrb[6].mxu1 }
 0x105   : > { %v903_v57 = vpop.f32.mrb[7].mxu0  ;;  %v927_v58 = vpop.f32.mrb[7].mxu1 }
 0x106   : > { %v685_v59 = vadd.f32 %v901_v53, %v1160_v35  ;;  %v693_v60 = vadd.f32 %v925_v54, %v1160_v35  ;;  %v904_v61 = vadd.f32 %v903_v57, %v902_v55  ;;  %v928_v62 = vadd.f32 %v927_v58, %v926_v56 }
 0x108   : > { %701 = vst [vmem:[%s1167_s8 + $0x10] sm:$0xff] %v685_v59  ;;  %709 = vst [vmem:[%s1167_s8 + $0x50] sm:$0xff] %v693_v60  ;;  %v686_v63 = vadd.f32 %v904_v61, %v1160_v35  ;;  %v694_v0 = vadd.f32 %v928_v62, %v1160_v35 }
 0x10a   : > { %702 = vst [vmem:[%s1167_s8 + $0x18] sm:$0xff] %v686_v63  ;;  %710 = vst [vmem:[%s1167_s8 + $0x58] sm:$0xff] %v694_v0  ;;  %v905_v1 = vpop.f32.mrb[8].mxu0  ;;  %v929_v2 = vpop.f32.mrb[8].mxu1 }
 0x10b   : > { %v906_v3 = vpop.f32.mrb[9].mxu0  ;;  %v930_v4 = vpop.f32.mrb[9].mxu1 }
 0x10c   : > { %v907_v5 = vadd.f32 %v906_v3, %v905_v1  ;;  %v931_v6 = vadd.f32 %v930_v4, %v929_v2  ;;  %v908_v7 = vpop.f32.mrb[10].mxu0  ;;  %v932_v8 = vpop.f32.mrb[10].mxu1 }
 0x10d   : > { %v909_v9 = vpop.f32.mrb[11].mxu0  ;;  %v933_v10 = vpop.f32.mrb[11].mxu1 }
 0x10e   : > { %v687_v11 = vadd.f32 %v907_v5, %v1160_v35  ;;  %v695_v12 = vadd.f32 %v931_v6, %v1160_v35  ;;  %v910_v13 = vadd.f32 %v909_v9, %v908_v7  ;;  %v934_v14 = vadd.f32 %v933_v10, %v932_v8 }
 0x110   : > { %703 = vst [vmem:[%s1167_s8 + $0x20] sm:$0xff] %v687_v11  ;;  %711 = vst [vmem:[%s1167_s8 + $0x60] sm:$0xff] %v695_v12  ;;  %v688_v15 = vadd.f32 %v910_v13, %v1160_v35  ;;  %v696_v16 = vadd.f32 %v934_v14, %v1160_v35 }
 0x112   : > { %704 = vst [vmem:[%s1167_s8 + $0x28] sm:$0xff] %v688_v15  ;;  %712 = vst [vmem:[%s1167_s8 + $0x68] sm:$0xff] %v696_v16  ;;  %v911_v17 = vpop.f32.mrb[12].mxu0  ;;  %v935_v18 = vpop.f32.mrb[12].mxu1 }
 0x113   : > { %v912_v19 = vpop.f32.mrb[13].mxu0  ;;  %v936_v20 = vpop.f32.mrb[13].mxu1 }
 0x114   : > { %v913_v21 = vadd.f32 %v912_v19, %v911_v17  ;;  %v937_v22 = vadd.f32 %v936_v20, %v935_v18  ;;  %v914_v23 = vpop.f32.mrb[14].mxu0  ;;  %v938_v24 = vpop.f32.mrb[14].mxu1 }
 0x115   : > { %v915_v25 = vpop.f32.mrb[15].mxu0  ;;  %v939_v26 = vpop.f32.mrb[15].mxu1 }
 0x116   : > { %v689_v27 = vadd.f32 %v913_v21, %v1160_v35  ;;  %v697_v28 = vadd.f32 %v937_v22, %v1160_v35  ;;  %v916_v29 = vadd.f32 %v915_v25, %v914_v23  ;;  %v940_v30 = vadd.f32 %v939_v26, %v938_v24 }
 0x118   : > { %705 = vst [vmem:[%s1167_s8 + $0x30] sm:$0xff] %v689_v27  ;;  %713 = vst [vmem:[%s1167_s8 + $0x70] sm:$0xff] %v697_v28  ;;  %v690_v31 = vadd.f32 %v916_v29, %v1160_v35  ;;  %v698_v32 = vadd.f32 %v940_v30, %v1160_v35 }
 0x11a   : > { %706 = vst [vmem:[%s1167_s8 + $0x38] sm:$0xff] %v690_v31  ;;  %714 = vst [vmem:[%s1167_s8 + $0x78] sm:$0xff] %v698_v32 }
 0x11b PF: > { %s13_s14 = sadd.s32 1, %s1043_s14   ;;  %s1214_s12 = smov %s1039_s13 }
 0x11c   : > { %p10_p5 = scmp.ge.s32.totalorder %s13_s14, 4   ;;  %s1215_s13 = smov %s1217_s15 }
 0x11e   :  { %12 = sbr.rel (!%p10_p5) target bundleno = 2 (0x2), region = 76 }

// kernel: gcn_encoder_forward.4
= control target key start
LH: loop header
LB: loop body
LE: loop exit
PB: predicated region body
PF: predicated region fallthrough
CT: control target
= control target key end

     0   :  { %s1516_s21 = smov 0   ;;  %s1518_s22 = smov 0   ;;  %s1706_s0 = inlined_call_operand.vmem [shape: bf16[256,256], index: 0, kind: input, shape index: {}]   ;;  %s1707_s1 = inlined_call_operand.vmem [shape: bf16[256,128], index: 1, kind: input, shape index: {}]   ;;  %s1708_s2 = inlined_call_operand.vmem [shape: f32[1,128], index: 2, kind: input, shape index: {}]   ;;  %s1709_s3 = inlined_call_operand.vmem [shape: f32[1,128], index: 3, kind: input, shape index: {}]   ;;  %s1710_s4 = inlined_call_operand.vmem [shape: f32[1,128], index: 4, kind: input, shape index: {}]   ;;  %s1711_s5 = inlined_call_operand.vmem [shape: bf16[128,128], index: 5, kind: input, shape index: {}]   ;;  %s1712_s6 = inlined_call_operand.vmem [shape: bf16[256,128], index: 6, kind: output, shape index: {}]  }
   0x1   :  { %s1520_s23 = smov 0  }
   0x2 LB: > { %s28_s24 = sadd.s32 1, %s1475_s22  ;;  %p1142_p0 = scmp.ge.s32.totalorder %s1479_s23, 1  ;;  %s1479_s23 = sphi %s1520_s23, %s16_s23   ;;  %s1475_s22 = sphi %s1518_s22, %s1714_s22   ;;  %s1471_s21 = sphi %s1516_s21, %s1713_s21  }
   0x3   : > { %p30_p1 = scmp.ge.s32.totalorder %s28_s24, 2  ;;  %p244_p2 = scmp.lt.s32.totalorder %s1479_s23, 3 }
   0x5   : > { %s1716_s24 = smov (%p30_p1, %s28_s24), 0  ;;  %p245_p3 = pnand %p1142_p0, %p244_p2 }
   0x6   : > { %v1409_v0 = vld [vmem:[%s1707_s1 + $0x40] sm:$0xff] (!%p245_p3)   ;;  %s1143_s27 = sshll.u32 (!%p245_p3), %s1471_s21, 4  ;;  %v1411_v2 = vld [vmem:[%s1707_s1 + $0x48] sm:$0xff] (!%p245_p3)   ;;  %v1413_v4 = vld [vmem:[%s1707_s1 + $0x50] sm:$0xff] (!%p245_p3)  }
   0x7   : > { %248 = sbr.rel (%p245_p3) target bundleno = 540 (0x21c), region = 44  ;;  %v1410_v1 = vld [vmem:[%s1707_s1] sm:$0xff] (!%p245_p3)   ;;  %1273 = vmatprep.subr.bf16.mxu0 (!%p245_p3), %v1409_v0  ;;  %v1412_v3 = vld [vmem:[%s1707_s1 + $0x8] sm:$0xff] (!%p245_p3)   ;;  %p286_p4 = scmp.lt.s32.totalorder (!%p245_p3), %s1143_s27, 31  ;;  %v1414_v5 = vld [vmem:[%s1707_s1 + $0x10] sm:$0xff] (!%p245_p3)  }
   0x8   : > { %1274 = vmatpush3.bf16.msra.mxu0 (!%p245_p3), %v1410_v1  ;;  %v1415_v6 = vld [vmem:[%s1707_s1 + $0x58] sm:$0xff] (!%p245_p3)   ;;  %v1417_v8 = vld [vmem:[%s1707_s1 + $0x60] sm:$0xff] (!%p245_p3)   ;;  %v1419_v10 = vld [vmem:[%s1707_s1 + $0x68] sm:$0xff] (!%p245_p3)  }
   0x9   : > { %1275 = vmatprep.subr.bf16.mxu0 (!%p245_p3), %v1411_v2  ;;  %v1416_v7 = vld [vmem:[%s1707_s1 + $0x18] sm:$0xff] (!%p245_p3)   ;;  %v1418_v9 = vld [vmem:[%s1707_s1 + $0x20] sm:$0xff] (!%p245_p3)   ;;  %v1420_v12 = vld [vmem:[%s1707_s1 + $0x28] sm:$0xff] (!%p245_p3)  }
   0xa   : > { %v1421_v13 = vld [vmem:[%s1707_s1 + $0x70] sm:$0xff] (!%p245_p3)   ;;  %v1423_v15 = vld [vmem:[%s1707_s1 + $0x78] sm:$0xff] (!%p245_p3)   ;;  %v1449_v17 = vld [vmem:[%s1711_s5] sm:$0xff] (!%p245_p3)  }
   0xb   : > { %v1422_v14 = vld [vmem:[%s1707_s1 + $0x30] sm:$0xff] (!%p245_p3)   ;;  %v1424_v16 = vld [vmem:[%s1707_s1 + $0x38] sm:$0xff] (!%p245_p3)   ;;  %v1450_v19 = vld [vmem:[%s1711_s5 + $0x8] sm:$0xff] (!%p245_p3)   ;;  %1353 = vmatprep.subr.bf16.mxu1 (!%p245_p3), %v1449_v17 }
   0xc   : > { %1276 = vmatpush3.bf16.msra.mxu0 (!%p245_p3), %v1412_v3  ;;  %1354 = vmatpush3.bf16.msra.mxu1 (!%p245_p3), %v1449_v17  ;;  %v1451_v34 = vld [vmem:[%s1711_s5 + $0x10] sm:$0xff] (!%p245_p3)   ;;  %v1452_v35 = vld [vmem:[%s1711_s5 + $0x18] sm:$0xff] (!%p245_p3)   ;;  %v1453_v36 = vld [vmem:[%s1711_s5 + $0x20] sm:$0xff] (!%p245_p3)  }
   0xd   : > { %1277 = vmatprep.subr.bf16.mxu0 (!%p245_p3), %v1413_v4  ;;  %1355 = vmatprep.subr.bf16.mxu1 (!%p245_p3), %v1450_v19  ;;  %v1454_v37 = vld [vmem:[%s1711_s5 + $0x28] sm:$0xff] (!%p245_p3)   ;;  %v1455_v38 = vld [vmem:[%s1711_s5 + $0x30] sm:$0xff] (!%p245_p3)   ;;  %v1456_v39 = vld [vmem:[%s1711_s5 + $0x38] sm:$0xff] (!%p245_p3)  }
   0xe   : > { %s1718_s27 = smov (!%p286_p4, %s1143_s27), 31  ;;  %v1633_v42 = vld [vmem:[%s1708_s2] ss:$0 sm:$0xff] }
   0xf   : > { %s1209_s18 = sshll.u32 %s1718_s27, 3  ;;  %v1638_v46 = vld [vmem:[%s1709_s3] ss:$0 sm:$0xff]  ;;  %s1147_s20 = sshll.u32 %s1718_s27, 2 }
  0x10   : > { %1278 = vmatpush3.bf16.msra.mxu0 %v1414_v5  ;;  %s1567_s26 = scalar_lea.vmem %s1706_s0, %s1209_s18  ;;  %1356 = vmatpush3.bf16.msra.mxu1 %v1450_v19  ;;  %v1644_v49 = vld [vmem:[%s1710_s4] ss:$0 sm:$0xff]  ;;  %s306_s28 = scalar_lea.vmem %s1712_s6, %s1147_s20 }
  0x11   : > { %1279 = vmatprep.subr.bf16.mxu0 %v1415_v6  ;;  %v1427_v11 = vld [vmem:[%s1567_s26 + $0x4] ss:$8 sps:$4 sm:$0xff]   ;;  %v1425_v18 = vld [vmem:[%s1567_s26] ss:$8 sps:$4 sm:$0xff]   ;;  %v1428_v20 = vld [vmem:[%s1567_s26 + $0x14] ss:$8 sps:$4 sm:$0xff]   ;;  %1357 = vmatprep.subr.bf16.mxu1 %v1451_v34 }
  0x12   : > { %601 = vmatprep.mubr.bf16.mxu0 %v1427_v11  ;;  %v1430_v21 = vld [vmem:[%s1567_s26 + $0x10] ss:$8 sps:$4 sm:$0xff]   ;;  %v1431_v22 = vld [vmem:[%s1567_s26 + $0x24] ss:$8 sps:$4 sm:$0xff]   ;;  %v1433_v23 = vld [vmem:[%s1567_s26 + $0x20] ss:$8 sps:$4 sm:$0xff]  }
  0x13   : > { %v1434_v24 = vld [vmem:[%s1567_s26 + $0x34] ss:$8 sps:$4 sm:$0xff]   ;;  %v1436_v25 = vld [vmem:[%s1567_s26 + $0x30] ss:$8 sps:$4 sm:$0xff]   ;;  %v1437_v26 = vld [vmem:[%s1567_s26 + $0x44] ss:$8 sps:$4 sm:$0xff]  }
  0x14   : > { %1280 = vmatpush3.bf16.msra.mxu0 %v1416_v7  ;;  %v1439_v27 = vld [vmem:[%s1567_s26 + $0x40] ss:$8 sps:$4 sm:$0xff]   ;;  %v1440_v28 = vld [vmem:[%s1567_s26 + $0x54] ss:$8 sps:$4 sm:$0xff]   ;;  %v1442_v29 = vld [vmem:[%s1567_s26 + $0x50] ss:$8 sps:$4 sm:$0xff]   ;;  %1358 = vmatpush3.bf16.msra.mxu1 %v1451_v34 }
  0x15   : > { %1281 = vmatprep.subr.bf16.mxu0 %v1417_v8  ;;  %v1443_v30 = vld [vmem:[%s1567_s26 + $0x64] ss:$8 sps:$4 sm:$0xff]   ;;  %v1445_v31 = vld [vmem:[%s1567_s26 + $0x60] ss:$8 sps:$4 sm:$0xff]   ;;  %v1446_v32 = vld [vmem:[%s1567_s26 + $0x74] ss:$8 sps:$4 sm:$0xff]   ;;  %1359 = vmatprep.subr.bf16.mxu1 %v1452_v35 }
  0x16   : > { %v1448_v33 = vld [vmem:[%s1567_s26 + $0x70] ss:$8 sps:$4 sm:$0xff]  }
  0x18   : > { %1282 = vmatpush3.bf16.msra.mxu0 %v1418_v9  ;;  %1360 = vmatpush3.bf16.msra.mxu1 %v1452_v35 }
  0x19   : > { %1283 = vmatprep.subr.bf16.mxu0 %v1419_v10  ;;  %1361 = vmatprep.subr.bf16.mxu1 %v1453_v36 }
  0x1c   : > { %1284 = vmatpush3.bf16.msra.mxu0 %v1420_v12  ;;  %1362 = vmatpush3.bf16.msra.mxu1 %v1453_v36 }
  0x1d   : > { %1285 = vmatprep.subr.bf16.mxu0 %v1421_v13  ;;  %1363 = vmatprep.subr.bf16.mxu1 %v1454_v37 }
  0x20   : > { %1286 = vmatpush3.bf16.msra.mxu0 %v1422_v14  ;;  %1364 = vmatpush3.bf16.msra.mxu1 %v1454_v37 }
  0x21   : > { %1287 = vmatprep.subr.bf16.mxu0 %v1423_v15  ;;  %1365 = vmatprep.subr.bf16.mxu1 %v1455_v38 }
  0x24   : > { %1288 = vmatpush3.bf16.msra.mxu0 %v1424_v16  ;;  %1366 = vmatpush3.bf16.msra.mxu1 %v1455_v38 }
  0x25   : > { %1367 = vmatprep.subr.bf16.mxu1 %v1456_v39 }
  0x27   : > { %602 = vmatmul.mubr.bf16.vlgmr.msra.gmra.mrb[0].mxu0 %v1425_v18 }
  0x28   : > { %609 = vmatprep.mubr.bf16.mxu0 %v1428_v20  ;;  %1368 = vmatpush3.bf16.msra.mxu1 %v1456_v39 }
  0x2f   : > { %610 = vmatmul.mubr.bf16.gmra.mrb[4].mxu0 %v1430_v21 }
  0x30   : > { %617 = vmatprep.mubr.bf16.mxu0 %v1431_v22 }
  0x37   : > { %618 = vmatmul.mubr.bf16.gmra.mrb[8].mxu0 %v1433_v23 }
  0x38   : > { %625 = vmatprep.mubr.bf16.mxu0 %v1434_v24 }
  0x3f   : > { %626 = vmatmul.mubr.bf16.gmra.mrb[12].mxu0 %v1436_v25 }
  0x40   : > { %633 = vmatprep.mubr.bf16.mxu0 %v1437_v26 }
  0x47   : > { %634 = vmatmul.mubr.bf16.gmra.mrb[16].mxu0 %v1439_v27 }
  0x48   : > { %641 = vmatprep.mubr.bf16.mxu0 %v1440_v28 }
  0x4f   : > { %642 = vmatmul.mubr.bf16.gmra.mrb[20].mxu0 %v1442_v29 }
  0x50   : > { %649 = vmatprep.mubr.bf16.mxu0 %v1443_v30 }
  0x57   : > { %650 = vmatmul.mubr.bf16.gmra.mrb[24].mxu0 %v1445_v31 }
  0x58   : > { %657 = vmatprep.mubr.bf16.mxu0 %v1446_v32 }
  0x5f   : > { %658 = vmatmul.mubr.bf16.gmra.mrb[28].mxu0 %v1448_v33 }
  0xfa   : > { %v1289_v40 = vpop.f32.mrb[0].mxu0 }
  0xfb   : > { %v1290_v41 = vpop.f32.mrb[1].mxu0 }
  0xfc   : > { %v1291_v43 = vadd.f32 %v1290_v41, %v1289_v40  ;;  %v1292_v44 = vpop.f32.mrb[2].mxu0 }
  0xfd   : > { %v1293_v45 = vpop.f32.mrb[3].mxu0 }
  0xfe   : > { %v724_v47 = vadd.f32 %v1291_v43, %v1633_v42  ;;  %v1294_v48 = vadd.f32 %v1293_v45, %v1292_v44 }
 0x100   : > { %v725_v50 = vadd.f32 %v1294_v48, %v1633_v42  ;;  %v747_v51 = vmul.f32 %v1638_v46, %v724_v47 }
 0x102   : > { %v1295_v52 = vpop.f32.mrb[4].mxu0  ;;  %v748_v53 = vmul.f32 %v1638_v46, %v725_v50  ;;  %v770_v54 = vadd.f32 %v1644_v49, %v747_v51 }
 0x103   : > { %v1296_v55 = vpop.f32.mrb[5].mxu0 }
 0x104   : > { %v1297_v56 = vadd.f32 %v1296_v55, %v1295_v52  ;;  %v1298_v57 = vpop.f32.mrb[6].mxu0  ;;  %v771_v58 = vadd.f32 %v1644_v49, %v748_v53  ;;  %v786_v62 = vmax.f32 %v770_v54, 0.0 }
 0x105   : > { %v1299_v59 = vpop.f32.mrb[7].mxu0 }
 0x106   : > { %v726_v60 = vadd.f32 %v1297_v56, %v1633_v42  ;;  %v1300_v61 = vadd.f32 %v1299_v59, %v1298_v57  ;;  %v787_v63 = vmax.f32 %v771_v58, 0.0 }
 0x108   : > { %v749_v0 = vmul.f32 %v1638_v46, %v726_v60  ;;  %v727_v1 = vadd.f32 %v1300_v61, %v1633_v42  ;;  %v802_v2 = vpack.c.bf16 %v787_v63, %v786_v62 }
 0x10a   : > { %v750_v3 = vmul.f32 %v1638_v46, %v727_v1  ;;  %v1301_v4 = vpop.f32.mrb[8].mxu0  ;;  %1369 = vmatprep.mubr.bf16.mxu1 %v802_v2  ;;  %v772_v5 = vadd.f32 %v1644_v49, %v749_v0 }
 0x10b   : > { %v1302_v6 = vpop.f32.mrb[9].mxu0 }
 0x10c   : > { %v1303_v7 = vadd.f32 %v1302_v6, %v1301_v4  ;;  %v1304_v8 = vpop.f32.mrb[10].mxu0  ;;  %v773_v9 = vadd.f32 %v1644_v49, %v750_v3  ;;  %v788_v13 = vmax.f32 %v772_v5, 0.0 }
 0x10d   : > { %v1305_v10 = vpop.f32.mrb[11].mxu0 }
 0x10e   : > { %v728_v11 = vadd.f32 %v1303_v7, %v1633_v42  ;;  %v1306_v12 = vadd.f32 %v1305_v10, %v1304_v8  ;;  %v789_v14 = vmax.f32 %v773_v9, 0.0 }
 0x110   : > { %v751_v15 = vmul.f32 %v1638_v46, %v728_v11  ;;  %v729_v16 = vadd.f32 %v1306_v12, %v1633_v42  ;;  %v803_v17 = vpack.c.bf16 %v789_v14, %v788_v13 }
 0x112   : > { %v752_v18 = vmul.f32 %v1638_v46, %v729_v16  ;;  %v1307_v19 = vpop.f32.mrb[12].mxu0  ;;  %1370 = vmatmul.mubr.bf16.vlgmr.msra.gmra.mrb[0].mxu1 %v803_v17  ;;  %v774_v20 = vadd.f32 %v1644_v49, %v751_v15 }
 0x113   : > { %v1308_v21 = vpop.f32.mrb[13].mxu0 }
 0x114   : > { %v1309_v22 = vadd.f32 %v1308_v21, %v1307_v19  ;;  %v1310_v23 = vpop.f32.mrb[14].mxu0  ;;  %v775_v24 = vadd.f32 %v1644_v49, %v752_v18  ;;  %v790_v28 = vmax.f32 %v774_v20, 0.0 }
 0x115   : > { %v1311_v25 = vpop.f32.mrb[15].mxu0 }
 0x116   : > { %v730_v26 = vadd.f32 %v1309_v22, %v1633_v42  ;;  %v1312_v27 = vadd.f32 %v1311_v25, %v1310_v23  ;;  %v791_v29 = vmax.f32 %v775_v24, 0.0 }
 0x118   : > { %v753_v30 = vmul.f32 %v1638_v46, %v730_v26  ;;  %v731_v31 = vadd.f32 %v1312_v27, %v1633_v42  ;;  %v804_v32 = vpack.c.bf16 %v791_v29, %v790_v28 }
 0x11a   : > { %v754_v33 = vmul.f32 %v1638_v46, %v731_v31  ;;  %v1313_v34 = vpop.f32.mrb[16].mxu0  ;;  %1373 = vmatprep.mubr.bf16.mxu1 %v804_v32  ;;  %v776_v35 = vadd.f32 %v1644_v49, %v753_v30 }
 0x11b   : > { %v1314_v36 = vpop.f32.mrb[17].mxu0 }
 0x11c   : > { %v1315_v37 = vadd.f32 %v1314_v36, %v1313_v34  ;;  %v1316_v38 = vpop.f32.mrb[18].mxu0  ;;  %v777_v39 = vadd.f32 %v1644_v49, %v754_v33  ;;  %v792_v44 = vmax.f32 %v776_v35, 0.0 }
 0x11d   : > { %v1317_v40 = vpop.f32.mrb[19].mxu0 }
 0x11e   : > { %v732_v41 = vadd.f32 %v1315_v37, %v1633_v42  ;;  %v1318_v43 = vadd.f32 %v1317_v40, %v1316_v38  ;;  %v793_v45 = vmax.f32 %v777_v39, 0.0 }
 0x120   : > { %v755_v47 = vmul.f32 %v1638_v46, %v732_v41  ;;  %v733_v48 = vadd.f32 %v1318_v43, %v1633_v42  ;;  %v805_v50 = vpack.c.bf16 %v793_v45, %v792_v44 }
 0x122   : > { %v756_v51 = vmul.f32 %v1638_v46, %v733_v48  ;;  %v1319_v52 = vpop.f32.mrb[20].mxu0  ;;  %1374 = vmatmul.mubr.bf16.gmra.mrb[4].mxu1 %v805_v50  ;;  %v778_v53 = vadd.f32 %v1644_v49, %v755_v47 }
 0x123   : > { %v1320_v54 = vpop.f32.mrb[21].mxu0 }
 0x124   : > { %v1321_v55 = vadd.f32 %v1320_v54, %v1319_v52  ;;  %v1322_v56 = vpop.f32.mrb[22].mxu0  ;;  %v779_v57 = vadd.f32 %v1644_v49, %v756_v51  ;;  %v794_v61 = vmax.f32 %v778_v53, 0.0 }
 0x125   : > { %v1323_v58 = vpop.f32.mrb[23].mxu0 }
 0x126   : > { %v734_v59 = vadd.f32 %v1321_v55, %v1633_v42  ;;  %v1324_v60 = vadd.f32 %v1323_v58, %v1322_v56  ;;  %v795_v62 = vmax.f32 %v779_v57, 0.0 }
 0x128   : > { %v757_v63 = vmul.f32 %v1638_v46, %v734_v59  ;;  %v735_v0 = vadd.f32 %v1324_v60, %v1633_v42  ;;  %v806_v1 = vpack.c.bf16 %v795_v62, %v794_v61 }
 0x12a   : > { %v758_v2 = vmul.f32 %v1638_v46, %v735_v0  ;;  %v1325_v3 = vpop.f32.mrb[24].mxu0  ;;  %1377 = vmatprep.mubr.bf16.mxu1 %v806_v1  ;;  %v780_v4 = vadd.f32 %v1644_v49, %v757_v63 }
 0x12b   : > { %v1326_v5 = vpop.f32.mrb[25].mxu0 }
 0x12c   : > { %v1327_v6 = vadd.f32 %v1326_v5, %v1325_v3  ;;  %v1328_v7 = vpop.f32.mrb[26].mxu0  ;;  %v781_v8 = vadd.f32 %v1644_v49, %v758_v2  ;;  %v796_v12 = vmax.f32 %v780_v4, 0.0 }
 0x12d   : > { %v1329_v9 = vpop.f32.mrb[27].mxu0 }
 0x12e   : > { %v736_v10 = vadd.f32 %v1327_v6, %v1633_v42  ;;  %v1330_v11 = vadd.f32 %v1329_v9, %v1328_v7  ;;  %v797_v13 = vmax.f32 %v781_v8, 0.0 }
 0x130   : > { %v759_v14 = vmul.f32 %v1638_v46, %v736_v10  ;;  %v737_v15 = vadd.f32 %v1330_v11, %v1633_v42  ;;  %v807_v16 = vpack.c.bf16 %v797_v13, %v796_v12 }
 0x132   : > { %v760_v17 = vmul.f32 %v1638_v46, %v737_v15  ;;  %v1331_v18 = vpop.f32.mrb[28].mxu0  ;;  %1378 = vmatmul.mubr.bf16.gmra.mrb[8].mxu1 %v807_v16  ;;  %v782_v19 = vadd.f32 %v1644_v49, %v759_v14 }
 0x133   : > { %v1332_v20 = vpop.f32.mrb[29].mxu0 }
 0x134   : > { %v1333_v21 = vadd.f32 %v1332_v20, %v1331_v18  ;;  %v1334_v22 = vpop.f32.mrb[30].mxu0  ;;  %v783_v23 = vadd.f32 %v1644_v49, %v760_v17  ;;  %v798_v27 = vmax.f32 %v782_v19, 0.0 }
 0x135   : > { %v1335_v24 = vpop.f32.mrb[31].mxu0 }
 0x136   : > { %v738_v25 = vadd.f32 %v1333_v21, %v1633_v42  ;;  %v1336_v26 = vadd.f32 %v1335_v24, %v1334_v22  ;;  %v799_v28 = vmax.f32 %v783_v23, 0.0 }
 0x138   : > { %v761_v29 = vmul.f32 %v1638_v46, %v738_v25  ;;  %v739_v30 = vadd.f32 %v1336_v26, %v1633_v42  ;;  %v808_v31 = vpack.c.bf16 %v799_v28, %v798_v27 }
 0x13a   : > { %v762_v32 = vmul.f32 %v1638_v46, %v739_v30  ;;  %1381 = vmatprep.mubr.bf16.mxu1 %v808_v31  ;;  %v784_v33 = vadd.f32 %v1644_v49, %v761_v29 }
 0x13c   : > { %v785_v34 = vadd.f32 %v1644_v49, %v762_v32  ;;  %v800_v35 = vmax.f32 %v784_v33, 0.0 }
 0x13e   : > { %v801_v36 = vmax.f32 %v785_v34, 0.0 }
 0x140   : > { %v809_v37 = vpack.c.bf16 %v801_v36, %v800_v35 }
 0x142   : > { %1382 = vmatmul.mubr.bf16.gmra.mrb[12].mxu1 %v809_v37 }
 0x1e5   : > { %v1371_v38 = vpop.f32.mrb[0].mxu1 }
 0x1e6   : > { %v908_v39 = vpop.f32.mrb[1].mxu1 }
 0x1e7   : > { %v1372_v42 = vpop.f32.mrb[2].mxu1 }
 0x1e8   : > { %v1234_v40 = vpack.c.bf16 %v1372_v42, %v1371_v38  ;;  %v911_v41 = vpop.f32.mrb[3].mxu1 }
 0x1e9   : > { %v1229_v46 = vpack.c.bf16 %v911_v41, %v908_v39 }
 0x1ea   : > { %1266 = vst [vmem:[%s306_s28 + $0x8] sm:$0xff] %v1234_v40  }
 0x1eb   : > { %1230 = vst [vmem:[%s306_s28] sm:$0xff] %v1229_v46  }
 0x1f5   : > { %v1375_v43 = vpop.f32.mrb[4].mxu1 }
 0x1f6   : > { %v924_v44 = vpop.f32.mrb[5].mxu1 }
 0x1f7   : > { %v1376_v49 = vpop.f32.mrb[6].mxu1 }
 0x1f8   : > { %v1244_v45 = vpack.c.bf16 %v1376_v49, %v1375_v43  ;;  %v927_v47 = vpop.f32.mrb[7].mxu1 }
 0x1f9   : > { %v1239_v48 = vpack.c.bf16 %v927_v47, %v924_v44 }
 0x1fa   : > { %1268 = vst [vmem:[%s306_s28 + $0x18] sm:$0xff] %v1244_v45  }
 0x1fb   : > { %1267 = vst [vmem:[%s306_s28 + $0x10] sm:$0xff] %v1239_v48  }
 0x205   : > { %v1379_v50 = vpop.f32.mrb[8].mxu1 }
 0x206   : > { %v940_v51 = vpop.f32.mrb[9].mxu1 }
 0x207   : > { %v1380_v52 = vpop.f32.mrb[10].mxu1 }
 0x208   : > { %v1254_v53 = vpack.c.bf16 %v1380_v52, %v1379_v50  ;;  %v943_v54 = vpop.f32.mrb[11].mxu1 }
 0x209   : > { %v1249_v55 = vpack.c.bf16 %v943_v54, %v940_v51 }
 0x20a   : > { %1270 = vst [vmem:[%s306_s28 + $0x28] sm:$0xff] %v1254_v53  }
 0x20b   : > { %1269 = vst [vmem:[%s306_s28 + $0x20] sm:$0xff] %v1249_v55  }
 0x215   : > { %v1383_v56 = vpop.f32.mrb[12].mxu1 }
 0x216   : > { %v956_v57 = vpop.f32.mrb[13].mxu1 }
 0x217   : > { %v1384_v58 = vpop.f32.mrb[14].mxu1 }
 0x218   : > { %v1264_v59 = vpack.c.bf16 %v1384_v58, %v1383_v56  ;;  %v959_v60 = vpop.f32.mrb[15].mxu1 }
 0x219   : > { %v1259_v61 = vpack.c.bf16 %v959_v60, %v956_v57 }
 0x21a   : > { %1272 = vst [vmem:[%s306_s28 + $0x38] sm:$0xff] %v1264_v59  }
 0x21b   : > { %1271 = vst [vmem:[%s306_s28 + $0x30] sm:$0xff] %v1259_v61  }
 0x21c PF: > { %s16_s23 = sadd.s32 1, %s1479_s23   ;;  %s1713_s21 = smov %s1475_s22 }
 0x21d   : > { %p13_p5 = scmp.ge.s32.totalorder %s16_s23, 4   ;;  %s1714_s22 = smov %s1716_s24 }
 0x21f   :  { %15 = sbr.rel (!%p13_p5) target bundleno = 2 (0x2), region = 85 }

</bundles_post_ra>
